<compile_context>
chip_gen: v7x
topology: tpu7x:2x2x1
jax: 0.10.0
libtpu: 0.0.40
codegen_flags: <defaults>
</compile_context>

<pallas_src>
import jax
import jax.numpy as jnp
import numpy as np
from jax.experimental import pallas as pl
from jax.experimental.pallas import tpu as pltpu

LANE = 128
SUBLANE_BF16 = 16  # bf16 packs 16 rows per vreg


def _round_up(x, m):
    return ((x + m - 1) // m) * m


# ------------------------------------------------------------------ fused Pallas kernel
def _evaluator_kernel(x_ref, w13_ref, bns_ref, bnb_ref, w2_ref, b2_ref, b3_ref,
                      mlp_ref, lin_ref, acc_ref):
    """One (batch-tile, K-tile) grid step of the whole Evaluator forward.

    x_ref   : (TM, TK)    f32   flattened features (cast to bf16 in VMEM)
    w13_ref : (TK, H+Cp)  bf16  [W1 | W3] concatenated along N
    bns_ref : (1, H)      f32   folded BN scale = gamma / sqrt(var + eps)
    bnb_ref : (1, H)      f32   folded BN shift = beta - mean * scale
    w2_ref  : (H, Cp)     bf16  Linear(H->C), class dim zero-padded to Cp
    b2_ref  : (1, Cp)     f32
    b3_ref  : (1, Cp)     f32
    mlp_ref : (TM, Cp)    f32   lgt_glb_mlp (lane-padded)
    lin_ref : (TM, Cp)    f32   lgt_glb_lin (lane-padded)
    acc_ref : (TM, H+Cp)  f32   VMEM accumulator for x @ [W1|W3]
    """
    k = pl.program_id(1)

    @pl.when(k == 0)
    def _():
        acc_ref[...] = jnp.zeros_like(acc_ref)

    # Cast to bf16 in VMEM (no extra HBM pass over x in the wrapper).
    x = x_ref[...].astype(jnp.bfloat16)
    acc_ref[...] += jnp.dot(x, w13_ref[...], preferred_element_type=jnp.float32)

    @pl.when(k == pl.num_programs(1) - 1)
    def _():
        hdim = bns_ref.shape[1]
        acc = acc_ref[...]
        # MLP head epilogue: BatchNorm(eval, folded) -> ReLU -> Linear + bias.
        h = acc[:, :hdim] * bns_ref[...] + bnb_ref[...]
        h = jnp.maximum(h, 0.0)
        # Precision contract: h (f32 accumulation) is recast to bf16 for the
        # small (H x Cp) second matmul; combined error stays well inside the
        # 5e-2 test tolerance for these magnitudes.
        mlp = jnp.dot(h.astype(w2_ref.dtype), w2_ref[...],
                      preferred_element_type=jnp.float32) + b2_ref[...]
        mlp_ref[...] = mlp.astype(mlp_ref.dtype)
        # Linear head straight from the flattened features.
        lin_ref[...] = (acc[:, hdim:] + b3_ref[...]).astype(lin_ref.dtype)


# ------------------------------------------------------------------ one-time weight prep
def prepare_evaluator_params(params, *, compute_dtype=jnp.bfloat16, eps=1e-5):
    """Fold BN, pad the class dim to a lane multiple, cast matmul weights to
    bf16 and concatenate W1|W3.  Call ONCE; per-step forward only launches the
    Pallas kernel."""
    w1 = params["mlp_w1"]                          # [D, H]
    w2, b2 = params["mlp_w2"], params["mlp_b2"]    # [H, C], [C]
    w3, b3 = params["lin_w"], params["lin_b"]      # [D, C], [C]
    d, hdim = w1.shape
    n_classes = w2.shape[1]
    cp = _round_up(n_classes, LANE)

    inv_std = 1.0 / jnp.sqrt(params["bn_var"].astype(jnp.float32) + eps)
    scale = params["bn_gamma"].astype(jnp.float32) * inv_std
    shift = (params["bn_beta"].astype(jnp.float32)
             - params["bn_mean"].astype(jnp.float32) * scale)

    w3p = jnp.pad(w3, ((0, 0), (0, cp - n_classes)))
    w13 = jnp.concatenate([w1, w3p], axis=1).astype(compute_dtype)   # [D, H+Cp]

    return {
        "w13": w13,
        "bn_scale": scale.reshape(1, hdim),
        "bn_shift": shift.reshape(1, hdim),
        "w2": jnp.pad(w2, ((0, 0), (0, cp - n_classes))).astype(compute_dtype),
        "b2": jnp.pad(b2, (0, cp - n_classes)).reshape(1, cp).astype(jnp.float32),
        "b3": jnp.pad(b3, (0, cp - n_classes)).reshape(1, cp).astype(jnp.float32),
    }


def _choose_k_tile(d):
    """Stream the feature dim only when it is large enough to matter."""
    if d <= 2048:
        return d
    for t in (1024, 512, 256):
        if d % t == 0:
            return t
    return d  # ragged feature dims: fall back to a single K block


# ------------------------------------------------------------------ per-step forward
def evaluator_forward(prep, ftr_1, *, n_classes, k_tile=None):
    """ftr_1: [B, D, 1, 1] (or any [B, D, ...] with trailing 1s).
    Returns (lgt_glb_mlp, lgt_glb_lin), each [B, n_classes] float32."""
    w13, bns, bnb = prep["w13"], prep["bn_scale"], prep["bn_shift"]
    w2, b2, b3 = prep["w2"], prep["b2"], prep["b3"]
    d, hcp = w13.shape
    hdim = bns.shape[1]
    cp = w2.shape[1]

    b = ftr_1.shape[0]
    x = ftr_1.reshape(b, -1)          # Flatten; .detach() is a no-op for the forward value
    assert x.shape[1] == d, (x.shape, d)

    # Batch: pad only to the bf16 sublane multiple (usually a no-op), never to a
    # full tile; the last M tile may be ragged and Pallas masks the edge writes.
    bp = _round_up(b, SUBLANE_BF16)
    if bp != b:
        x = jnp.pad(x, ((0, bp - b), (0, 0)))

    # M tile: one tile for small batches; >=2 "parallel" grid steps for larger
    # batches so v7x's two TensorCores both get work (harmless 1-step overhead
    # on single-TC v5e/v6e).
    if bp <= 256:
        tm = bp
    else:
        tm = min(512, _round_up((bp + 1) // 2, SUBLANE_BF16))
    grid_m = int(pl.cdiv(bp, tm))

    # K tile: stream [W1|W3] and x in slabs when D is large so the resident
    # weight block stays small (v7x has only 64 MiB VMEM per TensorCore).
    tk = k_tile if k_tile is not None else _choose_k_tile(d)
    if d % tk != 0:
        tk = d
    grid_k = d // tk

    # Explicit scoped-VMEM budget sized to the real working set (+ headroom).
    need = (2 * tm * tk * 4                 # x tile, double-buffered, f32
            + 2 * tk * hcp * 2              # [W1|W3] slab, double-buffered, bf16
            + 2 * hdim * cp * 2             # W2, bf16
            + 2 * (2 * hdim + 2 * cp) * 4   # BN scale/shift + biases
            + 2 * 2 * tm * cp * 4           # two outputs, double-buffered
            + tm * hcp * 4)                 # f32 accumulator scratch
    vmem_limit = min(max(int(1.5 * need) + (2 << 20), 32 << 20), 56 << 20)

    flops = 2 * bp * d * hcp + 2 * bp * hdim * cp
    bytes_accessed = (bp * d * 4 + d * hcp * 2 + hdim * cp * 2
                      + (2 * hdim + 2 * cp) * 4 + 2 * bp * cp * 4)

    mlp_p, lin_p = pl.pallas_call(
        _evaluator_kernel,
        out_shape=(jax.ShapeDtypeStruct((bp, cp), jnp.float32),
                   jax.ShapeDtypeStruct((bp, cp), jnp.float32)),
        grid=(grid_m, grid_k),
        in_specs=[
            pl.BlockSpec((tm, tk), lambda m, k: (m, k)),      # x (f32, cast in VMEM)
            pl.BlockSpec((tk, hcp), lambda m, k: (k, 0)),     # [W1 | W3]
            pl.BlockSpec((1, hdim), lambda m, k: (0, 0)),     # BN scale (grid-invariant)
            pl.BlockSpec((1, hdim), lambda m, k: (0, 0)),     # BN shift
            pl.BlockSpec((hdim, cp), lambda m, k: (0, 0)),    # W2
            pl.BlockSpec((1, cp), lambda m, k: (0, 0)),       # b2
            pl.BlockSpec((1, cp), lambda m, k: (0, 0)),       # b3
        ],
        out_specs=(pl.BlockSpec((tm, cp), lambda m, k: (m, 0)),
                   pl.BlockSpec((tm, cp), lambda m, k: (m, 0))),
        scratch_shapes=[pltpu.VMEM((tm, hcp), jnp.float32)],
        compiler_params=pltpu.CompilerParams(
            dimension_semantics=("parallel", "arbitrary"),
            vmem_limit_bytes=vmem_limit),
        cost_estimate=pl.CostEstimate(flops=flops, transcendentals=0,
                                      bytes_accessed=bytes_accessed),
    )(x, w13, bns, bnb, w2, b2, b3)

    return mlp_p[:b, :n_classes], lin_p[:b, :n_classes]


# ------------------------------------------------------------------ params + reference
def init_evaluator_params(key, dim_1, n_classes, n_hidden=1024):
    ks = jax.random.split(key, 9)
    s = 0.05
    return {
        # block_glb_mlp: Linear(D,1024,bias=False) -> BN(1024) -> ReLU -> Linear(1024,C)
        "mlp_w1": s * jax.random.normal(ks[0], (dim_1, n_hidden), jnp.float32),
        "bn_gamma": 1.0 + 0.1 * jax.random.normal(ks[1], (n_hidden,), jnp.float32),
        "bn_beta": 0.1 * jax.random.normal(ks[2], (n_hidden,), jnp.float32),
        "bn_mean": 0.1 * jax.random.normal(ks[3], (n_hidden,), jnp.float32),
        "bn_var": jnp.abs(1.0 + 0.1 * jax.random.normal(ks[4], (n_hidden,), jnp.float32)),
        "mlp_w2": s * jax.random.normal(ks[5], (n_hidden, n_classes), jnp.float32),
        "mlp_b2": s * jax.random.normal(ks[6], (n_classes,), jnp.float32),
        # block_glb_lin: Linear(D, C, bias=True)
        "lin_w": s * jax.random.normal(ks[7], (dim_1, n_classes), jnp.float32),
        "lin_b": s * jax.random.normal(ks[8], (n_classes,), jnp.float32),
    }


def evaluator_reference(params, ftr_1):
    """Pure-JAX f32 reference (eval-mode semantics) for correctness checking."""
    b = ftr_1.shape[0]
    x = ftr_1.reshape(b, -1)
    eps = 1e-5
    h = x @ params["mlp_w1"]
    h = (h - params["bn_mean"]) / jnp.sqrt(params["bn_var"] + eps)
    h = h * params["bn_gamma"] + params["bn_beta"]
    h = jnp.maximum(h, 0.0)
    mlp = h @ params["mlp_w2"] + params["mlp_b2"]
    lin = x @ params["lin_w"] + params["lin_b"]
    return mlp, lin


if __name__ == "__main__":
    root = jax.random.PRNGKey(0)
    k_in1, k_par1, k_in2, k_par2 = jax.random.split(root, 4)

    fwd = jax.jit(evaluator_forward, static_argnames=("n_classes", "k_tile"))

    # --- config 1: default path (single K block, single M tile) -----------------
    batch, dim_1, n_classes = 32, 128, 10
    ftr_1 = jax.random.normal(k_in1, (batch, dim_1, 1, 1), jnp.float32)
    params1 = init_evaluator_params(k_par1, dim_1, n_classes)
    prep1 = prepare_evaluator_params(params1)        # one-time weight prep (hoisted)

    mlp1, lin1 = jax.block_until_ready(fwd(prep1, ftr_1, n_classes=n_classes))
    assert mlp1.shape == (batch, n_classes) and lin1.shape == (batch, n_classes)
    assert mlp1.dtype == jnp.float32 and lin1.dtype == jnp.float32
    assert bool(jnp.all(jnp.isfinite(mlp1))) and bool(jnp.all(jnp.isfinite(lin1)))
    ref_mlp1, ref_lin1 = evaluator_reference(params1, ftr_1)
    np.testing.assert_allclose(np.asarray(mlp1), np.asarray(ref_mlp1), rtol=5e-2, atol=5e-2)
    np.testing.assert_allclose(np.asarray(lin1), np.asarray(ref_lin1), rtol=5e-2, atol=5e-2)

    # --- config 2: ragged batch + forced K tiling (accumulator path) ------------
    batch2, dim_2 = 7, 256
    ftr_2 = jax.random.normal(k_in2, (batch2, dim_2, 1, 1), jnp.float32)
    params2 = init_evaluator_params(k_par2, dim_2, n_classes)
    prep2 = prepare_evaluator_params(params2)

    mlp2, lin2 = jax.block_until_ready(
        fwd(prep2, ftr_2, n_classes=n_classes, k_tile=128))
    assert mlp2.shape == (batch2, n_classes) and lin2.shape == (batch2, n_classes)
    ref_mlp2, ref_lin2 = evaluator_reference(params2, ftr_2)
    np.testing.assert_allclose(np.asarray(mlp2), np.asarray(ref_mlp2), rtol=5e-2, atol=5e-2)
    np.testing.assert_allclose(np.asarray(lin2), np.asarray(ref_lin2), rtol=5e-2, atol=5e-2)

    print("KERNEL_OK")
</pallas_src>

<mosaic_0001>
module attributes {stable_mosaic.version = 11 : i64} {
  func.func @_evaluator_kernel(%arg0: i32, %arg1: i32, %arg2: memref<32x128xf32, #tpu.memory_space<vmem>>, %arg3: memref<128x1152xbf16, #tpu.memory_space<vmem>>, %arg4: memref<1x1024xf32, #tpu.memory_space<vmem>>, %arg5: memref<1x1024xf32, #tpu.memory_space<vmem>>, %arg6: memref<1024x128xbf16, #tpu.memory_space<vmem>>, %arg7: memref<1x128xf32, #tpu.memory_space<vmem>>, %arg8: memref<1x128xf32, #tpu.memory_space<vmem>>, %arg9: memref<32x128xf32, #tpu.memory_space<vmem>>, %arg10: memref<32x128xf32, #tpu.memory_space<vmem>>, %arg11: memref<32x1152xf32, #tpu.memory_space<vmem>>) attributes {dimension_semantics = [#tpu.dimension_semantics<parallel>, #tpu.dimension_semantics<arbitrary>], iteration_bounds = array<i64: 1, 1>, scalar_prefetch = 0 : i64, scratch_operands = 1 : i64, tpu.core_type = #tpu.core_type<tc>, window_params = [{transform_indices = @transform_0, window_bounds = array<i64: 32, 128>}, {transform_indices = @transform_1, window_bounds = array<i64: 128, 1152>}, {pipeline_mode = #tpu.pipeline_mode<synchronous>, transform_indices = @transform_2, window_bounds = array<i64: 1, 1024>}, {pipeline_mode = #tpu.pipeline_mode<synchronous>, transform_indices = @transform_3, window_bounds = array<i64: 1, 1024>}, {pipeline_mode = #tpu.pipeline_mode<synchronous>, transform_indices = @transform_4, window_bounds = array<i64: 1024, 128>}, {pipeline_mode = #tpu.pipeline_mode<synchronous>, transform_indices = @transform_5, window_bounds = array<i64: 1, 128>}, {pipeline_mode = #tpu.pipeline_mode<synchronous>, transform_indices = @transform_6, window_bounds = array<i64: 1, 128>}, {transform_indices = @transform_7, window_bounds = array<i64: 32, 128>}, {transform_indices = @transform_8, window_bounds = array<i64: 32, 128>}]} {
    %c0_i32 = arith.constant 0 : i32
    %0 = arith.cmpi eq, %arg1, %c0_i32 : i32
    %1 = arith.extui %0 : i1 to i32
    %c0_i32_0 = arith.constant 0 : i32
    %2 = arith.cmpi ne, %1, %c0_i32_0 : i32
    scf.if %2 {
      %cst_10 = arith.constant 0.000000e+00 : f32
      %13 = vector.broadcast %cst_10 : f32 to vector<32x1152xf32>
      %c0_11 = arith.constant 0 : index
      %c0_12 = arith.constant 0 : index
      %14 = vector.load %arg11[%c0_11, %c0_12] : memref<32x1152xf32, #tpu.memory_space<vmem>>, vector<32x1152xf32>
      tpu.vector_store %arg11[%c0_11, %c0_12], %13 {strides = array<i32>} : memref<32x1152xf32, #tpu.memory_space<vmem>>, vector<32x1152xf32>,
    } else {
    }
    %c0 = arith.constant 0 : index
    %c0_1 = arith.constant 0 : index
    %3 = vector.load %arg2[%c0, %c0_1] : memref<32x128xf32, #tpu.memory_space<vmem>>, vector<32x128xf32>
    %4 = arith.truncf %3 : vector<32x128xf32> to vector<32x128xbf16>
    %c0_2 = arith.constant 0 : index
    %c0_3 = arith.constant 0 : index
    %5 = vector.load %arg11[%c0_2, %c0_3] : memref<32x1152xf32, #tpu.memory_space<vmem>>, vector<32x1152xf32>
    %c0_4 = arith.constant 0 : index
    %c0_5 = arith.constant 0 : index
    %6 = vector.load %arg3[%c0_4, %c0_5] : memref<128x1152xbf16, #tpu.memory_space<vmem>>, vector<128x1152xbf16>
    %cst = arith.constant dense<0.000000e+00> : vector<32x1152xf32>
    %7 = tpu.matmul %4, %6, %cst {dimension_numbers = #tpu.dot_dimension_numbers<[1], [0], [0], [1], [0, 0, 1, 1], [], []>} : vector<32x128xbf16>, vector<128x1152xbf16>, vector<32x1152xf32> -> vector<32x1152xf32>
    %8 = arith.addf %5, %7 : vector<32x1152xf32>
    %c0_6 = arith.constant 0 : index
    %c0_7 = arith.constant 0 : index
    %9 = vector.load %arg11[%c0_6, %c0_7] : memref<32x1152xf32, #tpu.memory_space<vmem>>, vector<32x1152xf32>
    tpu.vector_store %arg11[%c0_6, %c0_7], %8 {strides = array<i32>} : memref<32x1152xf32, #tpu.memory_space<vmem>>, vector<32x1152xf32>,
    %c0_i32_8 = arith.constant 0 : i32
    %10 = arith.cmpi eq, %arg1, %c0_i32_8 : i32
    %11 = arith.extui %10 : i1 to i32
    %c0_i32_9 = arith.constant 0 : i32
    %12 = arith.cmpi ne, %11, %c0_i32_9 : i32
    scf.if %12 {
      %c0_10 = arith.constant 0 : index
      %c0_11 = arith.constant 0 : index
      %13 = vector.load %arg11[%c0_10, %c0_11] : memref<32x1152xf32, #tpu.memory_space<vmem>>, vector<32x1152xf32>
      %14 = vector.extract_strided_slice %13 {offsets = [0, 0], sizes = [32, 1024], strides = [1, 1]} : vector<32x1152xf32> to vector<32x1024xf32>
      %c0_12 = arith.constant 0 : index
      %c0_13 = arith.constant 0 : index
      %15 = vector.load %arg4[%c0_12, %c0_13] : memref<1x1024xf32, #tpu.memory_space<vmem>>, vector<1x1024xf32>
      %16 = vector.broadcast %15 : vector<1x1024xf32> to vector<32x1024xf32>
      %17 = arith.mulf %14, %16 : vector<32x1024xf32>
      %c0_14 = arith.constant 0 : index
      %c0_15 = arith.constant 0 : index
      %18 = vector.load %arg5[%c0_14, %c0_15] : memref<1x1024xf32, #tpu.memory_space<vmem>>, vector<1x1024xf32>
      %19 = vector.broadcast %18 : vector<1x1024xf32> to vector<32x1024xf32>
      %20 = arith.addf %17, %19 : vector<32x1024xf32>
      %cst_16 = arith.constant 0.000000e+00 : f32
      %21 = vector.broadcast %cst_16 : f32 to vector<32x1024xf32>
      %22 = arith.maximumf %20, %21 : vector<32x1024xf32>
      %23 = arith.truncf %22 : vector<32x1024xf32> to vector<32x1024xbf16>
      %c0_17 = arith.constant 0 : index
      %c0_18 = arith.constant 0 : index
      %24 = vector.load %arg6[%c0_17, %c0_18] : memref<1024x128xbf16, #tpu.memory_space<vmem>>, vector<1024x128xbf16>
      %cst_19 = arith.constant dense<0.000000e+00> : vector<32x128xf32>
      %25 = tpu.matmul %23, %24, %cst_19 {dimension_numbers = #tpu.dot_dimension_numbers<[1], [0], [0], [1], [0, 0, 1, 1], [], []>} : vector<32x1024xbf16>, vector<1024x128xbf16>, vector<32x128xf32> -> vector<32x128xf32>
      %c0_20 = arith.constant 0 : index
      %c0_21 = arith.constant 0 : index
      %26 = vector.load %arg7[%c0_20, %c0_21] : memref<1x128xf32, #tpu.memory_space<vmem>>, vector<1x128xf32>
      %27 = vector.broadcast %26 : vector<1x128xf32> to vector<32x128xf32>
      %28 = arith.addf %25, %27 : vector<32x128xf32>
      %c0_22 = arith.constant 0 : index
      %c0_23 = arith.constant 0 : index
      %29 = vector.load %arg9[%c0_22, %c0_23] : memref<32x128xf32, #tpu.memory_space<vmem>>, vector<32x128xf32>
      tpu.vector_store %arg9[%c0_22, %c0_23], %28 {strides = array<i32>} : memref<32x128xf32, #tpu.memory_space<vmem>>, vector<32x128xf32>,
      %30 = vector.extract_strided_slice %13 {offsets = [0, 1024], sizes = [32, 128], strides = [1, 1]} : vector<32x1152xf32> to vector<32x128xf32>
      %c0_24 = arith.constant 0 : index
      %c0_25 = arith.constant 0 : index
      %31 = vector.load %arg8[%c0_24, %c0_25] : memref<1x128xf32, #tpu.memory_space<vmem>>, vector<1x128xf32>
      %32 = vector.broadcast %31 : vector<1x128xf32> to vector<32x128xf32>
      %33 = arith.addf %30, %32 : vector<32x128xf32>
      %c0_26 = arith.constant 0 : index
      %c0_27 = arith.constant 0 : index
      %34 = vector.load %arg10[%c0_26, %c0_27] : memref<32x128xf32, #tpu.memory_space<vmem>>, vector<32x128xf32>
      tpu.vector_store %arg10[%c0_26, %c0_27], %33 {strides = array<i32>} : memref<32x128xf32, #tpu.memory_space<vmem>>, vector<32x128xf32>,
    } else {
    }
    return
  }
  func.func @transform_0(%arg0: i32, %arg1: i32) -> (i32, i32) {
    %c0_i32 = arith.constant 0 : i32
    return %arg0, %arg1 : i32, i32
  }
  func.func @transform_1(%arg0: i32, %arg1: i32) -> (i32, i32) {
    %c0_i32 = arith.constant 0 : i32
    %c0_i32_0 = arith.constant 0 : i32
    return %arg1, %c0_i32 : i32, i32
  }
  func.func @transform_2(%arg0: i32, %arg1: i32) -> (i32, i32) {
    %c0_i32 = arith.constant 0 : i32
    %c0_i32_0 = arith.constant 0 : i32
    %c0_i32_1 = arith.constant 0 : i32
    return %c0_i32, %c0_i32_0 : i32, i32
  }
  func.func @transform_3(%arg0: i32, %arg1: i32) -> (i32, i32) {
    %c0_i32 = arith.constant 0 : i32
    %c0_i32_0 = arith.constant 0 : i32
    %c0_i32_1 = arith.constant 0 : i32
    return %c0_i32, %c0_i32_0 : i32, i32
  }
  func.func @transform_4(%arg0: i32, %arg1: i32) -> (i32, i32) {
    %c0_i32 = arith.constant 0 : i32
    %c0_i32_0 = arith.constant 0 : i32
    %c0_i32_1 = arith.constant 0 : i32
    return %c0_i32, %c0_i32_0 : i32, i32
  }
  func.func @transform_5(%arg0: i32, %arg1: i32) -> (i32, i32) {
    %c0_i32 = arith.constant 0 : i32
    %c0_i32_0 = arith.constant 0 : i32
    %c0_i32_1 = arith.constant 0 : i32
    return %c0_i32, %c0_i32_0 : i32, i32
  }
  func.func @transform_6(%arg0: i32, %arg1: i32) -> (i32, i32) {
    %c0_i32 = arith.constant 0 : i32
    %c0_i32_0 = arith.constant 0 : i32
    %c0_i32_1 = arith.constant 0 : i32
    return %c0_i32, %c0_i32_0 : i32, i32
  }
  func.func @transform_7(%arg0: i32, %arg1: i32) -> (i32, i32) {
    %c0_i32 = arith.constant 0 : i32
    %c0_i32_0 = arith.constant 0 : i32
    return %arg0, %c0_i32 : i32, i32
  }
  func.func @transform_8(%arg0: i32, %arg1: i32) -> (i32, i32) {
    %c0_i32 = arith.constant 0 : i32
    %c0_i32_0 = arith.constant 0 : i32
    return %arg0, %c0_i32 : i32, i32
  }
}

</mosaic_0001>

<bundles_post_ra>
// kernel: evaluator_forward.1
= control target key start
LH: loop header
LB: loop body
LE: loop exit
PB: predicated region body
PF: predicated region fallthrough
CT: control target
= control target key end

     0   :  { %14 = vsyncpa [#allocation4], 0  ;;  %s2838_s0 = inlined_call_operand.hbm [shape: f32[32,128], index: 0, kind: input, shape index: {}]   ;;  %s2839_s1 = inlined_call_operand.hbm [shape: bf16[128,1152], index: 1, kind: input, shape index: {}]   ;;  %s2840_s2 = inlined_call_operand.vmem [shape: f32[1,1024], index: 2, kind: input, shape index: {}]   ;;  %s2841_s3 = inlined_call_operand.hbm [shape: f32[1,1024], index: 3, kind: input, shape index: {}]   ;;  %s2842_s4 = inlined_call_operand.hbm [shape: bf16[1024,128], index: 4, kind: input, shape index: {}]   ;;  %s2843_s5 = inlined_call_operand.vmem [shape: f32[1,128], index: 5, kind: input, shape index: {}]   ;;  %s2844_s6 = inlined_call_operand.vmem [shape: f32[1,128], index: 6, kind: input, shape index: {}]   ;;  %s2845_s7 = inlined_call_operand.vmem [shape: f32[32,128], index: 7, kind: output, shape index: {0}]   ;;  %s2846_s8 = inlined_call_operand.vmem [shape: f32[32,128], index: 8, kind: output, shape index: {1}]  }
   0x1   :  { %15 = vsyncpa [#allocation6], 0 }
   0x2   :  { %16 = vsyncpa [#allocation9], 0  ;;  %s2494_s27 = smov [#allocation5]   ;;  %s2400_s9 = scalar_lea.hbm %s2839_s1, 9216 }
   0x3   :  { %s34_s28 = sshll.u32 %s2494_s27, 4  ;;  %p2401_p0 = scmp.ne.s32.totalorder %s2839_s1, %s2400_s9  ;;  %s35_s28 = int_to_ptr.vmem [resolvable:$true] %s34_s28 }
   0x4   :  { %p2404_p1 = scmp.lt.u32.totalorder %s2400_s9, %s2839_s1 }
   0x6   :  { %p2406_p2 = pnand %p2404_p1, %p2401_p0 }
   0x8   :  { %2409 = shalt.err (!%p2406_p2)
}
   0x9   :  { %s2410_s14 = scalar_lea.vmem %s35_s28, 9216  ;;  %p2415_p4 = scmp.lt.s32.totalorder %s35_s28, %s35_s28 }
   0xa   :  { %p2411_p3 = scmp.ne.s32.totalorder %s35_s28, %s2410_s14  ;;  %p2416_p5 = scmp.lt.s32.totalorder %s2410_s14, %s2410_s14 }
   0xc   :  { %p2417_p6 = por %p2416_p5, %p2415_p4 }
   0xe   :  { %p2418_p7 = pnand %p2417_p6, %p2411_p3 }
  0x10   :  { %2421 = shalt.err (!%p2418_p7)
}
  0x11   :  { %s2495_s15 = smov 576   ;;  %s2496_s16 = smov 36  }
  0x12   :  { %40 = dma.hbm_to_vmem [thread:$0]  %s2839_s1, 9216, %s35_s28, [#allocation6], %s2495_s15, %s2495_s15, %s2496_s16  }
  0x13   :  { %s2497_s19 = smov [#allocation3]   ;;  %s2422_s23 = scalar_lea.hbm %s2838_s0, 512 }
  0x14   :  { %s22_s20 = sshll.u32 %s2497_s19, 4  ;;  %p2423_p8 = scmp.ne.s32.totalorder %s2838_s0, %s2422_s23  ;;  %s23_s20 = int_to_ptr.vmem [resolvable:$true] %s22_s20 }
  0x15   :  { %p2426_p9 = scmp.lt.u32.totalorder %s2422_s23, %s2838_s0 }
  0x17   :  { %p2428_p10 = pnand %p2426_p9, %p2423_p8 }
  0x19   :  { %2431 = shalt.err (!%p2428_p10)
}
  0x1a   :  { %s2432_s29 = scalar_lea.vmem %s23_s20, 512  ;;  %p2437_p12 = scmp.lt.s32.totalorder %s23_s20, %s23_s20 }
  0x1b   :  { %p2433_p11 = scmp.ne.s32.totalorder %s23_s20, %s2432_s29  ;;  %p2438_p13 = scmp.lt.s32.totalorder %s2432_s29, %s2432_s29 }
  0x1d   :  { %p2439_p0 = por %p2438_p13, %p2437_p12 }
  0x1f   :  { %p2440_p1 = pnand %p2439_p0, %p2433_p11 }
  0x21   :  { %2443 = shalt.err (!%p2440_p1)
}
  0x22   :  { %s2498_s1 = smov 128   ;;  %s2499_s28 = smov 8  }
  0x23   :  { %28 = dma.hbm_to_vmem [thread:$0]  %s2838_s0, 512, %s23_s20, [#allocation4], %s2498_s1, %s2498_s1, %s2499_s28  }
  0x24   :  { %s2500_s10 = smov [#allocation7]   ;;  %s2501_s12 = smov [#allocation8]  }
  0x25   :  { %s49_s11 = sshll.u32 %s2500_s10, 4  ;;  %s58_s13 = sshll.u32 %s2501_s12, 4  ;;  %s50_s11 = int_to_ptr.vmem [resolvable:$true] %s49_s11  ;;  %s2574_s13 = int_to_ptr.vmem [resolvable:$true] %s58_s13 }
  0x26   :  { %s2444_s16 = scalar_lea.hbm %s2841_s3, 128 }
  0x27   :  { %p2445_p2 = scmp.ne.s32.totalorder %s2841_s3, %s2444_s16  ;;  %p2448_p3 = scmp.lt.u32.totalorder %s2444_s16, %s2841_s3 }
  0x29   :  { %p2450_p4 = pnand %p2448_p3, %p2445_p2 }
  0x2b   :  { %2453 = shalt.err (!%p2450_p4)
}
  0x2c   :  { %s2454_s0 = scalar_lea.vmem %s50_s11, 128  ;;  %p2459_p6 = scmp.lt.s32.totalorder %s50_s11, %s50_s11 }
  0x2d   :  { %p2455_p5 = scmp.ne.s32.totalorder %s50_s11, %s2454_s0  ;;  %p2460_p7 = scmp.lt.s32.totalorder %s2454_s0, %s2454_s0 }
  0x2f   :  { %p2461_p8 = por %p2460_p7, %p2459_p6 }
  0x31   :  { %p2462_p9 = pnand %p2461_p8, %p2455_p5 }
  0x33   :  { %2465 = shalt.err (!%p2462_p9)
}
  0x34   :  { %52 = dma.hbm_to_vmem [thread:$0]  %s2841_s3, 128, %s50_s11, [#allocation6]  }
  0x35   :  { %s2466_s25 = scalar_lea.hbm %s2842_s4, 8192 }
  0x36   :  { %p2467_p10 = scmp.ne.s32.totalorder %s2842_s4, %s2466_s25  ;;  %p2470_p11 = scmp.lt.u32.totalorder %s2466_s25, %s2842_s4 }
  0x38   :  { %p2472_p12 = pnand %p2470_p11, %p2467_p10 }
  0x3a   :  { %2475 = shalt.err (!%p2472_p12)
}
  0x3b   :  { %s2476_s28 = scalar_lea.vmem %s2574_s13, 8192  ;;  %p2481_p0 = scmp.lt.s32.totalorder %s2574_s13, %s2574_s13 }
  0x3c   :  { %p2477_p13 = scmp.ne.s32.totalorder %s2574_s13, %s2476_s28  ;;  %p2482_p1 = scmp.lt.s32.totalorder %s2476_s28, %s2476_s28 }
  0x3e   :  { %p2483_p2 = por %p2482_p1, %p2481_p0 }
  0x40   :  { %p2484_p3 = pnand %p2483_p2, %p2477_p13 }
  0x42   :  { %2487 = shalt.err (!%p2484_p3)
}
  0x43   :  { %s2502_s3 = smov 64   ;;  %s2503_s30 = smov 4  }
  0x44   :  { %64 = dma.hbm_to_vmem [thread:$0]  %s2842_s4, 8192, %s2574_s13, [#allocation9], %s2502_s3, %s2502_s3, %s2503_s30  }
  0x45   :  { %2488 = dma.done.wait [#allocation4], 512  }
  0x46   :  { %2489 = vsyncadd [#allocation4], 4294966784 }
  0x47   :  { %2490 = dma.done.wait [#allocation6], 9344  }
  0x48   :  { %2491 = vsyncadd [#allocation6], 4294957952 }
  0x49   :  { %2492 = dma.done.wait [#allocation9], 8192  }
  0x4a   :  { %2493 = vsyncadd [#allocation9], 4294959104  ;;  %v2504_v0 = vmov 0   ;;  %v2232_v1 = vld [vmem:[#allocation5 + $0x4] ss:$36 sps:$4 sm:$0xff]   ;;  %v124_v43 = vld [vmem:[#allocation3 + $0x10] sm:$0xff] }
  0x4b   :  { %644 = vmatprep.mubr.bf16.mxu0 %v2504_v0  ;;  %697 = vmatprep.mubr.bf16.mxu1 %v2504_v0  ;;  %v2234_v2 = vld [vmem:[#allocation5] ss:$36 sps:$4 sm:$0xff]   ;;  %v2235_v3 = vld [vmem:[#allocation5 + $0xc] ss:$36 sps:$4 sm:$0xff]   ;;  %v2241_v7 = vld [vmem:[#allocation5 + $0x54] ss:$36 sps:$4 sm:$0xff]  }
  0x4c   :  { %612 = vmatprep.subr.bf16.mxu0 %v2232_v1  ;;  %v2237_v4 = vld [vmem:[#allocation5 + $0x8] ss:$36 sps:$4 sm:$0xff]   ;;  %665 = vmatprep.subr.bf16.mxu1 %v2235_v3  ;;  %v2243_v8 = vld [vmem:[#allocation5 + $0x50] ss:$36 sps:$4 sm:$0xff]   ;;  %v2247_v11 = vld [vmem:[#allocation5 + $0x9c] ss:$36 sps:$4 sm:$0xff]  }
  0x4d   :  { %613 = vmatpush1.bf16.msra.mxu0 %v2234_v2  ;;  %v2238_v5 = vld [vmem:[#allocation5 + $0x4c] ss:$36 sps:$4 sm:$0xff]   ;;  %666 = vmatpush1.bf16.msra.mxu1 %v2237_v4  ;;  %v2244_v9 = vld [vmem:[#allocation5 + $0x94] ss:$36 sps:$4 sm:$0xff]   ;;  %v2250_v12 = vld [vmem:[#allocation5 + $0xdc] ss:$36 sps:$4 sm:$0xff]  }
  0x4e   :  { %v2240_v6 = vld [vmem:[#allocation5 + $0x48] ss:$36 sps:$4 sm:$0xff]   ;;  %614 = vmatprep.subr.bf16.mxu0 %v2238_v5  ;;  %667 = vmatprep.subr.bf16.mxu1 %v2241_v7  ;;  %v2246_v10 = vld [vmem:[#allocation5 + $0x90] ss:$36 sps:$4 sm:$0xff]   ;;  %v2249_v13 = vld [vmem:[#allocation5 + $0x98] ss:$36 sps:$4 sm:$0xff]  }
  0x4f   :  { %v2253_v14 = vld [vmem:[#allocation5 + $0xe4] ss:$36 sps:$4 sm:$0xff]   ;;  %v2252_v15 = vld [vmem:[#allocation5 + $0xd8] ss:$36 sps:$4 sm:$0xff]   ;;  %v2259_v18 = vld [vmem:[#allocation5 + $0x12c] ss:$36 sps:$4 sm:$0xff]  }
  0x50   :  { %v2256_v16 = vld [vmem:[#allocation5 + $0x124] ss:$36 sps:$4 sm:$0xff]   ;;  %v2262_v20 = vld [vmem:[#allocation5 + $0x16c] ss:$36 sps:$4 sm:$0xff]   ;;  %v2265_v22 = vld [vmem:[#allocation5 + $0x174] ss:$36 sps:$4 sm:$0xff]  }
  0x51   :  { %615 = vmatpush1.bf16.msra.mxu0 %v2240_v6  ;;  %668 = vmatpush1.bf16.msra.mxu1 %v2243_v8  ;;  %v2255_v17 = vld [vmem:[#allocation5 + $0xe0] ss:$36 sps:$4 sm:$0xff]   ;;  %v2261_v21 = vld [vmem:[#allocation5 + $0x128] ss:$36 sps:$4 sm:$0xff]   ;;  %v2268_v24 = vld [vmem:[#allocation5 + $0x1b4] ss:$36 sps:$4 sm:$0xff]  }
  0x52   :  { %616 = vmatprep.subr.bf16.mxu0 %v2244_v9  ;;  %669 = vmatprep.subr.bf16.mxu1 %v2247_v11  ;;  %v2258_v19 = vld [vmem:[#allocation5 + $0x120] ss:$36 sps:$4 sm:$0xff]   ;;  %v2264_v23 = vld [vmem:[#allocation5 + $0x168] ss:$36 sps:$4 sm:$0xff]   ;;  %v2267_v25 = vld [vmem:[#allocation5 + $0x170] ss:$36 sps:$4 sm:$0xff]  }
  0x53   :  { %v2271_v26 = vld [vmem:[#allocation5 + $0x1bc] ss:$36 sps:$4 sm:$0xff]   ;;  %v2270_v27 = vld [vmem:[#allocation5 + $0x1b0] ss:$36 sps:$4 sm:$0xff]   ;;  %v2277_v31 = vld [vmem:[#allocation5 + $0x204] ss:$36 sps:$4 sm:$0xff]  }
  0x54   :  { %v2273_v28 = vld [vmem:[#allocation5 + $0x1b8] ss:$36 sps:$4 sm:$0xff]   ;;  %v122_v32 = vld [vmem:[#allocation3] sm:$0xff]  ;;  %v123_v33 = vld [vmem:[#allocation3 + $0x8] sm:$0xff] }
  0x55   :  { %617 = vmatpush1.bf16.msra.mxu0 %v2246_v10  ;;  %670 = vmatpush1.bf16.msra.mxu1 %v2249_v13  ;;  %v2274_v29 = vld [vmem:[#allocation5 + $0x1fc] ss:$36 sps:$4 sm:$0xff]   ;;  %v2282_v34 = vld [vmem:[#allocation5 + $0x14] ss:$36 sps:$4 sm:$0xff]   ;;  %v2607_v36 = vpack.c.bf16 %v123_v33, %v122_v32  ;;  %v2291_v42 = vld [vmem:[#allocation5 + $0x64] ss:$36 sps:$4 sm:$0xff]  }
  0x56   :  { %618 = vmatprep.subr.bf16.mxu0 %v2250_v12  ;;  %671 = vmatprep.subr.bf16.mxu1 %v2253_v14  ;;  %v2276_v30 = vld [vmem:[#allocation5 + $0x1f8] ss:$36 sps:$4 sm:$0xff]   ;;  %v2279_v35 = vld [vmem:[#allocation5 + $0x200] ss:$36 sps:$4 sm:$0xff]   ;;  %v2280_v38 = vld [vmem:[#allocation5 + $0x10] ss:$36 sps:$4 sm:$0xff]  }
  0x57   :  { %v2285_v37 = vld [vmem:[#allocation5 + $0x1c] ss:$36 sps:$4 sm:$0xff]   ;;  %v2294_v45 = vld [vmem:[#allocation5 + $0xa4] ss:$36 sps:$4 sm:$0xff]   ;;  %v2297_v47 = vld [vmem:[#allocation5 + $0xac] ss:$36 sps:$4 sm:$0xff]  }
  0x58   :  { %v2288_v39 = vld [vmem:[#allocation5 + $0x5c] ss:$36 sps:$4 sm:$0xff]   ;;  %v2300_v50 = vld [vmem:[#allocation5 + $0xec] ss:$36 sps:$4 sm:$0xff]   ;;  %v2303_v52 = vld [vmem:[#allocation5 + $0xf4] ss:$36 sps:$4 sm:$0xff]  }
  0x59   :  { %619 = vmatpush1.bf16.msra.mxu0 %v2252_v15  ;;  %672 = vmatpush1.bf16.msra.mxu1 %v2255_v17  ;;  %v2283_v40 = vld [vmem:[#allocation5 + $0x18] ss:$36 sps:$4 sm:$0xff]   ;;  %v2289_v46 = vld [vmem:[#allocation5 + $0x60] ss:$36 sps:$4 sm:$0xff]   ;;  %v2295_v51 = vld [vmem:[#allocation5 + $0xa8] ss:$36 sps:$4 sm:$0xff]  }
  0x5a   :  { %620 = vmatprep.subr.bf16.mxu0 %v2256_v16  ;;  %673 = vmatprep.subr.bf16.mxu1 %v2259_v18  ;;  %v2286_v41 = vld [vmem:[#allocation5 + $0x58] ss:$36 sps:$4 sm:$0xff]   ;;  %v2292_v49 = vld [vmem:[#allocation5 + $0xa0] ss:$36 sps:$4 sm:$0xff]   ;;  %v2298_v53 = vld [vmem:[#allocation5 + $0xe8] ss:$36 sps:$4 sm:$0xff]  }
  0x5b   :  { %v125_v44 = vld [vmem:[#allocation3 + $0x18] sm:$0xff]  ;;  %v2301_v55 = vld [vmem:[#allocation5 + $0xf0] ss:$36 sps:$4 sm:$0xff]   ;;  %v2315_v60 = vld [vmem:[#allocation5 + $0x184] ss:$36 sps:$4 sm:$0xff]  }
  0x5c   :  { %v2613_v48 = vpack.c.bf16 %v125_v44, %v124_v43  ;;  %v2306_v54 = vld [vmem:[#allocation5 + $0x134] ss:$36 sps:$4 sm:$0xff]   ;;  %v2309_v56 = vld [vmem:[#allocation5 + $0x13c] ss:$36 sps:$4 sm:$0xff]   ;;  %v2318_v62 = vld [vmem:[#allocation5 + $0x1c4] ss:$36 sps:$4 sm:$0xff]  }
  0x5d   :  { %621 = vmatpush1.bf16.msra.mxu0 %v2258_v19  ;;  %674 = vmatpush1.bf16.msra.mxu1 %v2261_v21  ;;  %v2304_v57 = vld [vmem:[#allocation5 + $0x130] ss:$36 sps:$4 sm:$0xff]   ;;  %v2312_v58 = vld [vmem:[#allocation5 + $0x17c] ss:$36 sps:$4 sm:$0xff]   ;;  %v2319_v4 = vld [vmem:[#allocation5 + $0x1c8] ss:$36 sps:$4 sm:$0xff]  }
  0x5e   :  { %622 = vmatprep.subr.bf16.mxu0 %v2262_v20  ;;  %675 = vmatprep.subr.bf16.mxu1 %v2265_v22  ;;  %v2307_v59 = vld [vmem:[#allocation5 + $0x138] ss:$36 sps:$4 sm:$0xff]   ;;  %v2313_v63 = vld [vmem:[#allocation5 + $0x180] ss:$36 sps:$4 sm:$0xff]   ;;  %v2321_v1 = vld [vmem:[#allocation5 + $0x1cc] ss:$36 sps:$4 sm:$0xff]  }
  0x5f   :  { %v2310_v61 = vld [vmem:[#allocation5 + $0x178] ss:$36 sps:$4 sm:$0xff]   ;;  %v2316_v2 = vld [vmem:[#allocation5 + $0x1c0] ss:$36 sps:$4 sm:$0xff]   ;;  %v2324_v3 = vld [vmem:[#allocation5 + $0x20c] ss:$36 sps:$4 sm:$0xff]  }
  0x60   :  { %v2327_v5 = vld [vmem:[#allocation5 + $0x214] ss:$36 sps:$4 sm:$0xff]   ;;  %v2322_v6 = vld [vmem:[#allocation5 + $0x208] ss:$36 sps:$4 sm:$0xff]   ;;  %v2328_v7 = vld [vmem:[#allocation5 + $0x20] ss:$36 sps:$4 sm:$0xff]  }
  0x61   :  { %623 = vmatpush1.bf16.msra.mxu0 %v2264_v23  ;;  %676 = vmatpush1.bf16.msra.mxu1 %v2267_v25  ;;  %v2325_v8 = vld [vmem:[#allocation5 + $0x210] ss:$36 sps:$4 sm:$0xff]   ;;  %v2336_v9 = vld [vmem:[#allocation8 + $0x40] sm:$0xff]   ;;  %v2331_v15 = vld [vmem:[#allocation5 + $0xf8] ss:$36 sps:$4 sm:$0xff]  }
  0x62   :  { %624 = vmatprep.subr.bf16.mxu0 %v2268_v24  ;;  %677 = vmatprep.subr.bf16.mxu1 %v2271_v26  ;;  %v2329_v10 = vld [vmem:[#allocation5 + $0x68] ss:$36 sps:$4 sm:$0xff]   ;;  %v2339_v12 = vld [vmem:[#allocation8 + $0x48] sm:$0xff]   ;;  %v2343_v16 = vld [vmem:[#allocation8 + $0x50] sm:$0xff]  }
  0x63   :  { %v2337_v11 = vld [vmem:[#allocation8] sm:$0xff]   ;;  %v2330_v13 = vld [vmem:[#allocation5 + $0xb0] ss:$36 sps:$4 sm:$0xff]   ;;  %v2345_v17 = vld [vmem:[#allocation8 + $0x10] sm:$0xff]  }
  0x64   :  { %v2341_v14 = vld [vmem:[#allocation8 + $0x8] sm:$0xff]   ;;  %v2347_v18 = vld [vmem:[#allocation8 + $0x58] sm:$0xff]   ;;  %v2333_v21 = vld [vmem:[#allocation5 + $0x188] ss:$36 sps:$4 sm:$0xff]  }
  0x65   :  { %625 = vmatpush1.bf16.msra.mxu0 %v2270_v27  ;;  %678 = vmatpush1.bf16.msra.mxu1 %v2273_v28  ;;  %v2332_v19 = vld [vmem:[#allocation5 + $0x140] ss:$36 sps:$4 sm:$0xff]   ;;  %v2353_v22 = vld [vmem:[#allocation8 + $0x20] sm:$0xff]   ;;  %v2334_v23 = vld [vmem:[#allocation5 + $0x1d0] ss:$36 sps:$4 sm:$0xff]  }
  0x66   :  { %626 = vmatprep.subr.bf16.mxu0 %v2274_v29  ;;  %679 = vmatprep.subr.bf16.mxu1 %v2277_v31  ;;  %v2349_v20 = vld [vmem:[#allocation8 + $0x18] sm:$0xff]   ;;  %v2335_v24 = vld [vmem:[#allocation5 + $0x218] ss:$36 sps:$4 sm:$0xff]   ;;  %v2338_v25 = vld [vmem:[#allocation8 + $0xc0] sm:$0xff]  }
  0x67   :  { %v2340_v26 = vld [vmem:[#allocation8 + $0x80] sm:$0xff]   ;;  %v2342_v27 = vld [vmem:[#allocation8 + $0xc8] sm:$0xff]   ;;  %v2346_v29 = vld [vmem:[#allocation8 + $0xd0] sm:$0xff]  }
  0x68   :  { %v2344_v28 = vld [vmem:[#allocation8 + $0x88] sm:$0xff]   ;;  %v2350_v31 = vld [vmem:[#allocation8 + $0xd8] sm:$0xff]   ;;  %v2354_v33 = vld [vmem:[#allocation8 + $0xe0] sm:$0xff]  }
  0x69   :  { %627 = vmatpush1.bf16.msra.mxu0 %v2276_v30  ;;  %680 = vmatpush1.bf16.msra.mxu1 %v2279_v35  ;;  %v2348_v30 = vld [vmem:[#allocation8 + $0x90] sm:$0xff]   ;;  %v2352_v32 = vld [vmem:[#allocation8 + $0x98] sm:$0xff]   ;;  %v2356_v35 = vld [vmem:[#allocation8 + $0xa0] sm:$0xff]  }
  0x6a   :  { %718 = vmatprep.subr.bf16.mxu0 %v2282_v34  ;;  %771 = vmatprep.subr.bf16.mxu1 %v2285_v37  ;;  %v2355_v34 = vld [vmem:[#allocation8 + $0x68] sm:$0xff]   ;;  %v2364_v43 = vld [vmem:[#allocation8 + $0xb0] sm:$0xff]   ;;  %v2365_v44 = vld [vmem:[#allocation8 + $0x38] sm:$0xff]  }
  0x6b   :  { %v2358_v37 = vld [vmem:[#allocation8 + $0xe8] sm:$0xff]  }
  0x6c   :  { %645 = vmatmul.mubr.bf16.vlgmr.msra.gmra.mrb[0].mxu0 %v2607_v36  ;;  %698 = vmatmul.mubr.bf16.vlgmr.msra.gmra.mrb[0].mxu1 %v2607_v36 }
  0x6d   :  { %719 = vmatpush1.bf16.msra.mxu0 %v2280_v38  ;;  %654 = vmatprep.mubr.bf16.mxu0 %v2504_v0  ;;  %v2359_v38 = vld [vmem:[#allocation8 + $0x70] sm:$0xff]  }
  0x6e   :  { %720 = vmatprep.subr.bf16.mxu0 %v2288_v39  ;;  %772 = vmatpush1.bf16.msra.mxu1 %v2283_v40  ;;  %v2360_v39 = vld [vmem:[#allocation8 + $0xa8] sm:$0xff]   ;;  %v2361_v40 = vld [vmem:[#allocation8 + $0x30] sm:$0xff]  }
  0x6f   :  { %707 = vmatprep.mubr.bf16.mxu1 %v2504_v0  ;;  %773 = vmatprep.subr.bf16.mxu1 %v2291_v42  ;;  %v2363_v42 = vld [vmem:[#allocation8 + $0x78] sm:$0xff]  }
  0x71   :  { %721 = vmatpush1.bf16.msra.mxu0 %v2286_v41  ;;  %v2362_v41 = vld [vmem:[#allocation8 + $0xf0] sm:$0xff]  }
  0x72   :  { %722 = vmatprep.subr.bf16.mxu0 %v2294_v45  ;;  %774 = vmatpush1.bf16.msra.mxu1 %v2289_v46  ;;  %v2366_v45 = vld [vmem:[#allocation8 + $0xf8] sm:$0xff]  }
  0x73   :  { %775 = vmatprep.subr.bf16.mxu1 %v2297_v47  ;;  %v2367_v46 = vld [vmem:[#allocation8 + $0xb8] sm:$0xff]   ;;  %v2368_v47 = vld [vmem:[#allocation8 + $0x140] sm:$0xff]  }
  0x74   :  { %655 = vmatmul.mubr.bf16.gmra.mrb[4].mxu0 %v2613_v48  ;;  %708 = vmatmul.mubr.bf16.gmra.mrb[4].mxu1 %v2613_v48 }
  0x75   :  { %723 = vmatpush1.bf16.msra.mxu0 %v2292_v49  ;;  %750 = vmatprep.mubr.bf16.mxu0 %v2504_v0  ;;  %v986_v49 = vlaneseq }
  0x76   :  { %724 = vmatprep.subr.bf16.mxu0 %v2300_v50  ;;  %776 = vmatpush1.bf16.msra.mxu1 %v2295_v51 }
  0x77   :  { %803 = vmatprep.mubr.bf16.mxu1 %v2504_v0  ;;  %777 = vmatprep.subr.bf16.mxu1 %v2303_v52  ;;  %v2630_v50 = vshrl.u32 %v986_v49, 7  ;;  %v2636_v52 = vld [vmem:[%s2840_s2] sm:$0xff] }
  0x79   :  { %725 = vmatpush1.bf16.msra.mxu0 %v2298_v53  ;;  %v988_v51 = vsub.s32 0, %v2630_v50  ;;  %v992_v53 = vsub.s32 1, %v2630_v50 }
  0x7a   :  { %726 = vmatprep.subr.bf16.mxu0 %v2306_v54  ;;  %778 = vmatpush1.bf16.msra.mxu1 %v2301_v55  ;;  %v996_v54 = vsub.s32 2, %v2630_v50  ;;  %v2640_v55 = vld [vmem:[#allocation7] sm:$0xff] }
  0x7b   :  { %779 = vmatprep.subr.bf16.mxu1 %v2309_v56  ;;  %v1000_v56 = vsub.s32 3, %v2630_v50 }
  0x7d   :  { %727 = vmatpush1.bf16.msra.mxu0 %v2304_v57  ;;  %v989_v57 = vrot.slane %v2636_v52, %v988_v51 }
  0x7e   :  { %728 = vmatprep.subr.bf16.mxu0 %v2312_v58  ;;  %780 = vmatpush1.bf16.msra.mxu1 %v2307_v59  ;;  %v993_v58 = vrot.slane %v2636_v52, %v992_v53  ;;  %v2646_v59 = vrot.slane %v2640_v55, %v988_v51 }
  0x7f   :  { %781 = vmatprep.subr.bf16.mxu1 %v2315_v60  ;;  %v2649_v60 = vrot.slane %v2636_v52, %v996_v54 }
  0x81   :  { %729 = vmatpush1.bf16.msra.mxu0 %v2310_v61 }
  0x82   :  { %730 = vmatprep.subr.bf16.mxu0 %v2318_v62  ;;  %782 = vmatpush1.bf16.msra.mxu1 %v2313_v63  ;;  %v2652_v62 = vrot.slane %v2640_v55, %v992_v53  ;;  %v2655_v63 = vrot.slane %v2636_v52, %v1000_v56  ;;  %v2677_v53 = vld [vmem:[#allocation8 + $0x180] sm:$0xff]  }
  0x83   :  { %783 = vmatprep.subr.bf16.mxu1 %v2321_v1 }
  0x85   :  { %731 = vmatpush1.bf16.msra.mxu0 %v2316_v2 }
  0x86   :  { %732 = vmatprep.subr.bf16.mxu0 %v2324_v3  ;;  %784 = vmatpush1.bf16.msra.mxu1 %v2319_v4  ;;  %v2658_v3 = vrot.slane %v2640_v55, %v996_v54 }
  0x87   :  { %785 = vmatprep.subr.bf16.mxu1 %v2327_v5 }
  0x89   :  { %733 = vmatpush1.bf16.msra.mxu0 %v2322_v6 }
  0x8a   :  { %2185 = vmatprep.subr.bf16.mxu0 %v2328_v7  ;;  %786 = vmatpush1.bf16.msra.mxu1 %v2325_v8 }
  0x8b   :  { %2073 = vmatprep.subr.bf16.mxu1 %v2336_v9 }
  0x8c   :  { %751 = vmatmul.mubr.bf16.vlgmr.msra.gmra.mrb[8].mxu0 %v2607_v36 }
  0x8d   :  { %760 = vmatprep.mubr.bf16.mxu0 %v2504_v0  ;;  %2186 = vmatpush3.bf16.msra.mxu0 %v2328_v7  ;;  %v2661_v7 = vrot.slane %v2640_v55, %v1000_v56 }
  0x8e   :  { %804 = vmatmul.mubr.bf16.vlgmr.msra.gmra.mrb[8].mxu1 %v2607_v36  ;;  %2187 = vmatprep.subr.bf16.mxu0 %v2329_v10 }
  0x8f   :  { %813 = vmatprep.mubr.bf16.mxu1 %v2504_v0  ;;  %2074 = vmatpush3.bf16.msra.mxu1 %v2337_v11  ;;  %v2351_v0 = vld [vmem:[#allocation8 + $0x60] sm:$0xff]  }
  0x90   :  { %2075 = vmatprep.subr.bf16.mxu1 %v2339_v12 }
  0x91   :  { %2188 = vmatpush3.bf16.msra.mxu0 %v2329_v10 }
  0x92   :  { %2189 = vmatprep.subr.bf16.mxu0 %v2330_v13 }
  0x93   :  { %2076 = vmatpush3.bf16.msra.mxu1 %v2341_v14 }
  0x94   :  { %761 = vmatmul.mubr.bf16.gmra.mrb[12].mxu0 %v2613_v48  ;;  %2077 = vmatprep.subr.bf16.mxu1 %v2343_v16 }
  0x95   :  { %2190 = vmatpush3.bf16.msra.mxu0 %v2330_v13  ;;  %2201 = vmatprep.mubr.bf16.mxu0 %v2607_v36  ;;  %v2357_v36 = vld [vmem:[#allocation8 + $0x28] sm:$0xff]  }
  0x96   :  { %814 = vmatmul.mubr.bf16.gmra.mrb[12].mxu1 %v2613_v48  ;;  %2191 = vmatprep.subr.bf16.mxu0 %v2331_v15 }
  0x97   :  { %2078 = vmatpush3.bf16.msra.mxu1 %v2345_v17 }
  0x98   :  { %2079 = vmatprep.subr.bf16.mxu1 %v2347_v18 }
  0x99   :  { %2192 = vmatpush3.bf16.msra.mxu0 %v2331_v15 }
  0x9a   :  { %2193 = vmatprep.subr.bf16.mxu0 %v2332_v19 }
  0x9b   :  { %2080 = vmatpush3.bf16.msra.mxu1 %v2349_v20 }
  0x9c   :  { %2081 = vmatprep.subr.bf16.mxu1 %v2351_v0 }
  0x9d   :  { %2194 = vmatpush3.bf16.msra.mxu0 %v2332_v19 }
  0x9e   :  { %2195 = vmatprep.subr.bf16.mxu0 %v2333_v21 }
  0x9f   :  { %2082 = vmatpush3.bf16.msra.mxu1 %v2353_v22 }
  0xa0   :  { %2083 = vmatprep.subr.bf16.mxu1 %v2355_v34 }
  0xa1   :  { %2196 = vmatpush3.bf16.msra.mxu0 %v2333_v21 }
  0xa2   :  { %2197 = vmatprep.subr.bf16.mxu0 %v2334_v23 }
  0xa3   :  { %2084 = vmatpush3.bf16.msra.mxu1 %v2357_v36 }
  0xa4   :  { %2085 = vmatprep.subr.bf16.mxu1 %v2359_v38  ;;  %v2369_v38 = vld [vmem:[#allocation8 + $0x100] sm:$0xff]  }
  0xa5   :  { %2198 = vmatpush3.bf16.msra.mxu0 %v2334_v23 }
  0xa6   :  { %2199 = vmatprep.subr.bf16.mxu0 %v2335_v24 }
  0xa7   :  { %2086 = vmatpush3.bf16.msra.mxu1 %v2361_v40 }
  0xa8   :  { %2087 = vmatprep.subr.bf16.mxu1 %v2363_v42 }
  0xa9   :  { %2200 = vmatpush3.bf16.msra.mxu0 %v2335_v24 }
  0xaa   :  { %2101 = vmatprep.subr.bf16.mxu0 %v2338_v25 }
  0xab   :  { %2088 = vmatpush3.bf16.msra.mxu1 %v2365_v44 }
  0xac   :  { %2202 = vmatmul.mubr.bf16.vlgmr.msra.gmra.mrb[16].mxu0 %v2613_v48  ;;  %2129 = vmatprep.subr.bf16.mxu1 %v2368_v47  ;;  %v2627_v48 = vld [vmem:[#allocation8 + $0x1c0] sm:$0xff]  }
  0xad   :  { %2102 = vmatpush3.bf16.msra.mxu0 %v2340_v26 }
  0xae   :  { %2103 = vmatprep.subr.bf16.mxu0 %v2342_v27 }
  0xb1   :  { %2104 = vmatpush3.bf16.msra.mxu0 %v2344_v28 }
  0xb2   :  { %2105 = vmatprep.subr.bf16.mxu0 %v2346_v29 }
  0xb5   :  { %2106 = vmatpush3.bf16.msra.mxu0 %v2348_v30 }
  0xb6   :  { %2107 = vmatprep.subr.bf16.mxu0 %v2350_v31 }
  0xb9   :  { %2108 = vmatpush3.bf16.msra.mxu0 %v2352_v32 }
  0xba   :  { %2109 = vmatprep.subr.bf16.mxu0 %v2354_v33 }
  0xbd   :  { %2110 = vmatpush3.bf16.msra.mxu0 %v2356_v35 }
  0xbe   :  { %2111 = vmatprep.subr.bf16.mxu0 %v2358_v37 }
  0xc1   :  { %2112 = vmatpush3.bf16.msra.mxu0 %v2360_v39 }
  0xc2   :  { %2113 = vmatprep.subr.bf16.mxu0 %v2362_v41 }
  0xc5   :  { %2114 = vmatpush3.bf16.msra.mxu0 %v2364_v43  ;;  %v2371_v43 = vld [vmem:[#allocation8 + $0x148] sm:$0xff]  }
  0xc6   :  { %2115 = vmatprep.subr.bf16.mxu0 %v2366_v45 }
  0xc9   :  { %2116 = vmatpush3.bf16.msra.mxu0 %v2367_v46 }
  0xca   :  { %2157 = vmatprep.subr.bf16.mxu0 %v2627_v48 }
 0x13f   :  { %v646_v61 = vpop.f32.mrb[0].mxu0  ;;  %v699_v6 = vpop.f32.mrb[0].mxu1 }
 0x140   :  { %v1026_v1 = vmul.f32 %v989_v57, %v646_v61  ;;  %v648_v2 = vpop.f32.mrb[1].mxu0  ;;  %v1028_v10 = vmul.f32 %v2649_v60, %v699_v6  ;;  %v701_v12 = vpop.f32.mrb[1].mxu1 }
 0x141   :  { %v1027_v4 = vmul.f32 %v993_v58, %v648_v2  ;;  %v650_v5 = vpop.f32.mrb[2].mxu0  ;;  %v1029_v15 = vmul.f32 %v2655_v63, %v701_v12  ;;  %v703_v16 = vpop.f32.mrb[2].mxu1 }
 0x142   :  { %v1100_v8 = vadd.f32 %v2646_v59, %v1026_v1  ;;  %v1034_v9 = vmul.f32 %v989_v57, %v650_v5  ;;  %v652_v11 = vpop.f32.mrb[3].mxu0  ;;  %v1102_v18 = vadd.f32 %v2658_v3, %v1028_v10  ;;  %v1036_v19 = vmul.f32 %v2649_v60, %v703_v16  ;;  %v705_v20 = vpop.f32.mrb[3].mxu1  ;;  %v2683_v5 = vld [vmem:[#allocation8 + $0x1c8] sm:$0xff]  }
 0x143   :  { %v1101_v13 = vadd.f32 %v2652_v62, %v1027_v4  ;;  %v1035_v14 = vmul.f32 %v993_v58, %v652_v11  ;;  %v1103_v21 = vadd.f32 %v2661_v7, %v1029_v15  ;;  %v1037_v22 = vmul.f32 %v2655_v63, %v705_v20  ;;  %v2377_v20 = vld [vmem:[#allocation8 + $0x110] sm:$0xff]  }
 0x144   :  { %v1108_v17 = vadd.f32 %v2646_v59, %v1034_v9  ;;  %v1132_v23 = vmax.f32 %v1100_v8, 0.0  ;;  %v1134_v25 = vmax.f32 %v1102_v18, 0.0  ;;  %v1110_v26 = vadd.f32 %v2658_v3, %v1036_v19  ;;  %v2373_v9 = vld [vmem:[#allocation8 + $0x108] sm:$0xff]   ;;  %v2695_v19 = vld [vmem:[#allocation8 + $0x1d0] sm:$0xff]  }
 0x145   :  { %v1109_v0 = vadd.f32 %v2652_v62, %v1035_v14  ;;  %v1133_v27 = vmax.f32 %v1101_v13, 0.0  ;;  %v1135_v29 = vmax.f32 %v1103_v21, 0.0  ;;  %v1111_v30 = vadd.f32 %v2661_v7, %v1037_v22  ;;  %v2375_v14 = vld [vmem:[#allocation8 + $0x150] sm:$0xff]  }
 0x146   :  { %v1140_v24 = vmax.f32 %v1108_v17, 0.0  ;;  %v1142_v33 = vmax.f32 %v1110_v26, 0.0  ;;  %v2691_v17 = vld [vmem:[#allocation8 + $0x188] sm:$0xff]   ;;  %v2383_v26 = vld [vmem:[#allocation8 + $0x160] sm:$0xff]  }
 0x147   :  { %v1141_v28 = vmax.f32 %v1109_v0, 0.0  ;;  %v656_v31 = vpop.f32.mrb[4].mxu0  ;;  %v1143_v36 = vmax.f32 %v1111_v30, 0.0  ;;  %v709_v41 = vpop.f32.mrb[4].mxu1  ;;  %v2385_v30 = vld [vmem:[#allocation8 + $0x120] sm:$0xff]  }
 0x148   :  { %v1164_v32 = vpack.c.bf16 %v1140_v24, %v1132_v23  ;;  %v1042_v34 = vmul.f32 %v989_v57, %v656_v31  ;;  %v658_v35 = vpop.f32.mrb[5].mxu0  ;;  %v1166_v42 = vpack.c.bf16 %v1142_v33, %v1134_v25  ;;  %v1044_v46 = vmul.f32 %v2649_v60, %v709_v41  ;;  %v711_v49 = vpop.f32.mrb[5].mxu1  ;;  %v2698_v23 = vld [vmem:[#allocation8 + $0x190] sm:$0xff]   ;;  %v2381_v25 = vld [vmem:[#allocation8 + $0x118] sm:$0xff]  }
 0x149   :  { %v1165_v37 = vpack.c.bf16 %v1141_v28, %v1133_v27  ;;  %v1043_v39 = vmul.f32 %v993_v58, %v658_v35  ;;  %v660_v40 = vpop.f32.mrb[6].mxu0  ;;  %v1167_v51 = vpack.c.bf16 %v1143_v36, %v1135_v29  ;;  %v1045_v61 = vmul.f32 %v2655_v63, %v711_v49  ;;  %v713_v1 = vpop.f32.mrb[6].mxu1  ;;  %v2704_v27 = vld [vmem:[#allocation8 + $0x198] sm:$0xff]   ;;  %v2707_v28 = vld [vmem:[#allocation8 + $0x1e0] sm:$0xff]  }
 0x14a   :  { %v1116_v44 = vadd.f32 %v2646_v59, %v1042_v34  ;;  %v1050_v45 = vmul.f32 %v989_v57, %v660_v40  ;;  %v662_v47 = vpop.f32.mrb[7].mxu0  ;;  %v1118_v57 = vadd.f32 %v2658_v3, %v1044_v46  ;;  %v1052_v6 = vmul.f32 %v2649_v60, %v713_v1  ;;  %v715_v8 = vpop.f32.mrb[7].mxu1  ;;  %v2713_v34 = vld [vmem:[#allocation8 + $0x1a0] sm:$0xff]   ;;  %v2393_v1 = vld [vmem:[#allocation8 + $0x130] sm:$0xff]  }
 0x14b   :  { %1731 = vmatprep.mubr.bf16.mxu1 %v1165_v37  ;;  %v1117_v54 = vadd.f32 %v2652_v62, %v1043_v39  ;;  %v1051_v56 = vmul.f32 %v993_v58, %v662_v47  ;;  %1780 = vmatprep.mubr.bf16.mxu0 %v1167_v51  ;;  %v1119_v11 = vadd.f32 %v2661_v7, %v1045_v61  ;;  %v1004_v29 = vsub.s32 4, %v2630_v50  ;;  %v2720_v37 = vld [vmem:[#allocation8 + $0x1e8] sm:$0xff]   ;;  %v2745_v51 = vld [vmem:[#allocation8 + $0x1f0] sm:$0xff]  }
 0x14c   :  { %1732 = vmatmul.mubr.bf16.vlgmr.msra.gmra.mrb[16].mxu1 %v1164_v32  ;;  %v1148_v2 = vmax.f32 %v1116_v44, 0.0  ;;  %v1124_v4 = vadd.f32 %v2646_v59, %v1050_v45  ;;  %v1053_v12 = vmul.f32 %v2655_v63, %v715_v8  ;;  %1781 = vmatmul.mubr.bf16.vlgmr.msra.gmra.mrb[20].mxu0 %v1166_v42  ;;  %v1150_v13 = vmax.f32 %v1118_v57, 0.0  ;;  %v2387_v32 = vld [vmem:[#allocation8 + $0x168] sm:$0xff]  }
 0x14d   :  { %2130 = vmatpush3.bf16.msra.mxu1 %v2369_v38  ;;  %v1149_v10 = vmax.f32 %v1117_v54, 0.0  ;;  %v1125_v58 = vadd.f32 %v2652_v62, %v1051_v56  ;;  %v1126_v15 = vadd.f32 %v2658_v3, %v1052_v6  ;;  %2158 = vmatpush3.bf16.msra.mxu0 %v2677_v53  ;;  %v1151_v16 = vmax.f32 %v1119_v11, 0.0  ;;  %v2379_v3 = vld [vmem:[#allocation8 + $0x158] sm:$0xff]   ;;  %v2389_v39 = vld [vmem:[#allocation8 + $0x128] sm:$0xff]  }
 0x14e   :  { %2131 = vmatprep.subr.bf16.mxu1 %v2371_v43  ;;  %v1156_v59 = vmax.f32 %v1124_v4, 0.0  ;;  %v1127_v18 = vadd.f32 %v2661_v7, %v1053_v12  ;;  %2159 = vmatprep.subr.bf16.mxu0 %v2683_v5  ;;  %v2701_v7 = vld [vmem:[#allocation8 + $0x1d8] sm:$0xff]   ;;  %v1008_v31 = vsub.s32 5, %v2630_v50  ;;  %v1012_v33 = vsub.s32 6, %v2630_v50  ;;  %v2738_v45 = vld [vmem:[#allocation8 + $0x1a8] sm:$0xff]  }
 0x14f   :  { %v1157_v60 = vmax.f32 %v1125_v58, 0.0  ;;  %v1158_v62 = vmax.f32 %v1126_v15, 0.0  ;;  %v1016_v35 = vsub.s32 7, %v2630_v50  ;;  %v2718_v36 = vrot.slane %v2636_v52, %v1004_v29  ;;  %v2391_v50 = vld [vmem:[#allocation8 + $0x170] sm:$0xff]  }
 0x150   :  { %v1172_v63 = vpack.c.bf16 %v1156_v59, %v1148_v2  ;;  %v1159_v0 = vmax.f32 %v1127_v18, 0.0  ;;  %v2723_v38 = vrot.slane %v2636_v52, %v1008_v31  ;;  %v2726_v40 = vrot.slane %v2640_v55, %v1004_v29 }
 0x151   :  { %2132 = vmatpush3.bf16.msra.mxu1 %v2373_v9  ;;  %v1173_v21 = vpack.c.bf16 %v1157_v60, %v1149_v10  ;;  %v1174_v22 = vpack.c.bf16 %v1158_v62, %v1150_v13  ;;  %2160 = vmatpush3.bf16.msra.mxu0 %v2691_v17  ;;  %v2729_v41 = vrot.slane %v2636_v52, %v1012_v33  ;;  %v2395_v9 = vld [vmem:[#allocation8 + $0x178] sm:$0xff]  }
 0x152   :  { %2133 = vmatprep.subr.bf16.mxu1 %v2375_v14  ;;  %v1175_v24 = vpack.c.bf16 %v1159_v0, %v1151_v16  ;;  %2161 = vmatprep.subr.bf16.mxu0 %v2695_v19  ;;  %v2733_v43 = vrot.slane %v2640_v55, %v1008_v31  ;;  %v2736_v44 = vrot.slane %v2636_v52, %v1016_v35  ;;  %v2764_v60 = vld [vmem:[#allocation8 + $0x1f8] sm:$0xff]  }
 0x153   :  { %1739 = vmatprep.mubr.bf16.mxu1 %v1173_v21  ;;  %v2742_v49 = vrot.slane %v2640_v55, %v1012_v33  ;;  %v2749_v52 = vrot.slane %v2640_v55, %v1016_v35  ;;  %v2758_v55 = vld [vmem:[#allocation8 + $0x1b0] sm:$0xff]  }
 0x154   :  { %1740 = vmatmul.mubr.bf16.gmra.mrb[20].mxu1 %v1172_v63  ;;  %1788 = vmatprep.mubr.bf16.mxu0 %v1175_v24  ;;  %v2397_v63 = vld [vmem:[#allocation8 + $0x138] sm:$0xff]  }
 0x155   :  { %2134 = vmatpush3.bf16.msra.mxu1 %v2377_v20  ;;  %1789 = vmatmul.mubr.bf16.gmra.mrb[24].mxu0 %v1174_v22 }
 0x156   :  { %2135 = vmatprep.subr.bf16.mxu1 %v2379_v3  ;;  %2162 = vmatpush3.bf16.msra.mxu0 %v2698_v23 }
 0x157   :  { %2163 = vmatprep.subr.bf16.mxu0 %v2701_v7 }
 0x159   :  { %2136 = vmatpush3.bf16.msra.mxu1 %v2381_v25 }
 0x15a   :  { %2137 = vmatprep.subr.bf16.mxu1 %v2383_v26  ;;  %2164 = vmatpush3.bf16.msra.mxu0 %v2704_v27 }
 0x15b   :  { %2165 = vmatprep.subr.bf16.mxu0 %v2707_v28 }
 0x15d   :  { %2138 = vmatpush3.bf16.msra.mxu1 %v2385_v30  ;;  %v2772_v30 = vld [vmem:[#allocation8 + $0x1b8] sm:$0xff]  }
 0x15e   :  { %2139 = vmatprep.subr.bf16.mxu1 %v2387_v32  ;;  %2166 = vmatpush3.bf16.msra.mxu0 %v2713_v34 }
 0x15f   :  { %v752_v42 = vpop.f32.mrb[8].mxu0  ;;  %2167 = vmatprep.subr.bf16.mxu0 %v2720_v37 }
 0x160   :  { %v1030_v46 = vmul.f32 %v2718_v36, %v752_v42  ;;  %v754_v47 = vpop.f32.mrb[9].mxu0 }
 0x161   :  { %v1031_v54 = vmul.f32 %v2723_v38, %v754_v47  ;;  %2140 = vmatpush3.bf16.msra.mxu1 %v2389_v39  ;;  %v756_v56 = vpop.f32.mrb[10].mxu0  ;;  %v805_v61 = vpop.f32.mrb[8].mxu1 }
 0x162   :  { %v1104_v2 = vadd.f32 %v2726_v40, %v1030_v46  ;;  %v1038_v4 = vmul.f32 %v2718_v36, %v756_v56  ;;  %v1032_v57 = vmul.f32 %v2729_v41, %v805_v61  ;;  %v758_v6 = vpop.f32.mrb[11].mxu0  ;;  %v807_v8 = vpop.f32.mrb[9].mxu1  ;;  %2141 = vmatprep.subr.bf16.mxu1 %v2391_v50  ;;  %2168 = vmatpush3.bf16.msra.mxu0 %v2738_v45 }
 0x163   :  { %v1105_v10 = vadd.f32 %v2733_v43, %v1031_v54  ;;  %v1039_v58 = vmul.f32 %v2723_v38, %v758_v6  ;;  %v1033_v11 = vmul.f32 %v2736_v44, %v807_v8  ;;  %v809_v12 = vpop.f32.mrb[10].mxu1  ;;  %2169 = vmatprep.subr.bf16.mxu0 %v2745_v51 }
 0x164   :  { %v1112_v59 = vadd.f32 %v2726_v40, %v1038_v4  ;;  %v1106_v13 = vadd.f32 %v2742_v49, %v1032_v57  ;;  %v1040_v14 = vmul.f32 %v2729_v41, %v809_v12  ;;  %v811_v15 = vpop.f32.mrb[11].mxu1  ;;  %v1136_v20 = vmax.f32 %v1104_v2, 0.0 }
 0x165   :  { %v1113_v16 = vadd.f32 %v2733_v43, %v1039_v58  ;;  %v1107_v18 = vadd.f32 %v2749_v52, %v1033_v11  ;;  %v1041_v62 = vmul.f32 %v2736_v44, %v811_v15  ;;  %2142 = vmatpush3.bf16.msra.mxu1 %v2393_v1  ;;  %v1137_v22 = vmax.f32 %v1105_v10, 0.0 }
 0x166   :  { %v1144_v0 = vmax.f32 %v1112_v59, 0.0  ;;  %v1138_v21 = vmax.f32 %v1106_v13, 0.0  ;;  %v1114_v3 = vadd.f32 %v2742_v49, %v1040_v14  ;;  %2143 = vmatprep.subr.bf16.mxu1 %v2395_v9  ;;  %2170 = vmatpush3.bf16.msra.mxu0 %v2758_v55 }
 0x167   :  { %v1145_v24 = vmax.f32 %v1113_v16, 0.0  ;;  %v1139_v25 = vmax.f32 %v1107_v18, 0.0  ;;  %v1115_v26 = vadd.f32 %v2749_v52, %v1041_v62  ;;  %v762_v29 = vpop.f32.mrb[12].mxu0  ;;  %2171 = vmatprep.subr.bf16.mxu0 %v2764_v60 }
 0x168   :  { %v1168_v31 = vpack.c.bf16 %v1144_v0, %v1136_v20  ;;  %v1146_v32 = vmax.f32 %v1114_v3, 0.0  ;;  %v1046_v33 = vmul.f32 %v2718_v36, %v762_v29  ;;  %v764_v35 = vpop.f32.mrb[13].mxu0 }
 0x169   :  { %v1147_v39 = vmax.f32 %v1115_v26, 0.0  ;;  %v1047_v50 = vmul.f32 %v2723_v38, %v764_v35  ;;  %2144 = vmatpush3.bf16.msra.mxu1 %v2397_v63  ;;  %v766_v42 = vpop.f32.mrb[14].mxu0  ;;  %v1169_v46 = vpack.c.bf16 %v1145_v24, %v1137_v22  ;;  %v815_v47 = vpop.f32.mrb[12].mxu1 }
 0x16a   :  { %v1170_v54 = vpack.c.bf16 %v1146_v32, %v1138_v21  ;;  %v1120_v56 = vadd.f32 %v2726_v40, %v1046_v33  ;;  %v1054_v61 = vmul.f32 %v2718_v36, %v766_v42  ;;  %v768_v1 = vpop.f32.mrb[15].mxu0  ;;  %2205 = vmatprep.subr.bf16.mxu1 %v2627_v48  ;;  %v1048_v2 = vmul.f32 %v2729_v41, %v815_v47  ;;  %v817_v4 = vpop.f32.mrb[13].mxu1 }
 0x16b   :  { %v1121_v57 = vadd.f32 %v2733_v43, %v1047_v50  ;;  %v1055_v6 = vmul.f32 %v2723_v38, %v768_v1  ;;  %1829 = vmatprep.mubr.bf16.mxu1 %v1169_v46  ;;  %2172 = vmatpush3.bf16.msra.mxu0 %v2772_v30  ;;  %v1171_v8 = vpack.c.bf16 %v1147_v39, %v1139_v25  ;;  %v819_v9 = vpop.f32.mrb[14].mxu1 }
 0x16c   :  { %v1152_v10 = vmax.f32 %v1120_v56, 0.0  ;;  %v1128_v58 = vadd.f32 %v2726_v40, %v1054_v61  ;;  %1830 = vmatmul.mubr.bf16.vlgmr.msra.gmra.mrb[24].mxu1 %v1168_v31  ;;  %v1122_v36 = vadd.f32 %v2742_v49, %v1048_v2  ;;  %v1049_v48 = vmul.f32 %v2736_v44, %v817_v4  ;;  %v821_v11 = vpop.f32.mrb[15].mxu1 }
 0x16d   :  { %v1153_v12 = vmax.f32 %v1121_v57, 0.0  ;;  %v1129_v59 = vadd.f32 %v2733_v43, %v1055_v6  ;;  %2213 = vmatpush3.bf16.msra.mxu1 %v2677_v53  ;;  %1878 = vmatprep.mubr.bf16.mxu0 %v1171_v8  ;;  %v1056_v38 = vmul.f32 %v2729_v41, %v819_v9  ;;  %v1057_v13 = vmul.f32 %v2736_v44, %v821_v11 }
 0x16e   :  { %v1160_v14 = vmax.f32 %v1128_v58, 0.0  ;;  %1879 = vmatmul.mubr.bf16.vlgmr.msra.gmra.mrb[28].mxu0 %v1170_v54  ;;  %2206 = vmatprep.subr.bf16.mxu1 %v2683_v5  ;;  %v1123_v40 = vadd.f32 %v2749_v52, %v1049_v48  ;;  %v1154_v16 = vmax.f32 %v1122_v36, 0.0 }
 0x16f   :  { %v1161_v15 = vmax.f32 %v1129_v59, 0.0  ;;  %v1130_v18 = vadd.f32 %v2742_v49, %v1056_v38  ;;  %v1131_v62 = vadd.f32 %v2749_v52, %v1057_v13 }
 0x170   :  { %v1176_v43 = vpack.c.bf16 %v1160_v14, %v1152_v10  ;;  %v1155_v63 = vmax.f32 %v1123_v40, 0.0 }
 0x171   :  { %2214 = vmatpush3.bf16.msra.mxu1 %v2691_v17  ;;  %v1177_v53 = vpack.c.bf16 %v1161_v15, %v1153_v12  ;;  %v1162_v41 = vmax.f32 %v1130_v18, 0.0  ;;  %v1163_v20 = vmax.f32 %v1131_v62, 0.0  ;;  %v2062_v17 = vld [vmem:[%s2844_s6] ss:$0 sm:$0xff] }
 0x172   :  { %2207 = vmatprep.subr.bf16.mxu1 %v2695_v19 }
 0x173   :  { %1837 = vmatprep.mubr.bf16.mxu1 %v1177_v53  ;;  %v1178_v44 = vpack.c.bf16 %v1162_v41, %v1154_v16  ;;  %v1179_v5 = vpack.c.bf16 %v1163_v20, %v1155_v63 }
 0x174   :  { %1838 = vmatmul.mubr.bf16.gmra.mrb[28].mxu1 %v1176_v43 }
 0x175   :  { %2215 = vmatpush3.bf16.msra.mxu1 %v2698_v23  ;;  %1886 = vmatprep.mubr.bf16.mxu1 %v1179_v5 }
 0x176   :  { %2208 = vmatprep.subr.bf16.mxu1 %v2701_v7 }
 0x179   :  { %2216 = vmatpush3.bf16.msra.mxu1 %v2704_v27 }
 0x17a   :  { %2209 = vmatprep.subr.bf16.mxu1 %v2707_v28 }
 0x17d   :  { %2217 = vmatpush3.bf16.msra.mxu1 %v2713_v34 }
 0x17e   :  { %2210 = vmatprep.subr.bf16.mxu1 %v2720_v37  ;;  %v1997_v37 = vld [vmem:[%s2843_s5] ss:$0 sm:$0xff] }
 0x17f   :  { %v2203_v19 = vpop.f32.mrb[16].mxu0 }
 0x180   :  { %v1908_v49 = vadd.f32 %v2203_v19, %v2062_v17  ;;  %v858_v52 = vpop.f32.mrb[17].mxu0 }
 0x181   :  { %2218 = vmatpush3.bf16.msra.mxu1 %v2738_v45  ;;  %v1906_v23 = vadd.f32 %v2062_v17, %v858_v52  ;;  %v2204_v0 = vpop.f32.mrb[18].mxu0 }
 0x182   :  { %2211 = vmatprep.subr.bf16.mxu1 %v2745_v51  ;;  %1912 = vst [vmem:[%s2846_s8 + $0x10] sm:$0xff] %v1908_v49  ;;  %v1909_v7 = vadd.f32 %v2204_v0, %v2062_v17  ;;  %v861_v27 = vpop.f32.mrb[19].mxu0 }
 0x183   :  { %1910 = vst [vmem:[%s2846_s8] sm:$0xff] %v1906_v23  ;;  %v1907_v28 = vadd.f32 %v2062_v17, %v861_v27 }
 0x184   :  { %1913 = vst [vmem:[%s2846_s8 + $0x18] sm:$0xff] %v1909_v7 }
 0x185   :  { %2219 = vmatpush3.bf16.msra.mxu1 %v2758_v55  ;;  %1911 = vst [vmem:[%s2846_s8 + $0x8] sm:$0xff] %v1907_v28 }
 0x186   :  { %2212 = vmatprep.subr.bf16.mxu1 %v2764_v60 }
 0x189   :  { %2220 = vmatpush3.bf16.msra.mxu1 %v2772_v30 }
 0x18c   :  { %1887 = vmatmul.mubr.bf16.vlgmr.msra.gmra.mrb[32].mxu1 %v1178_v44 }
 0x21f   :  { %v2089_v34 = vpop.f32.mrb[16].mxu1  ;;  %v2117_v3 = vpop.f32.mrb[20].mxu0 }
 0x220   :  { %v2090_v45 = vpop.f32.mrb[17].mxu1  ;;  %v2118_v55 = vpop.f32.mrb[21].mxu0 }
 0x221   :  { %v2091_v51 = vadd.f32 %v2090_v45, %v2089_v34  ;;  %v2092_v21 = vpop.f32.mrb[18].mxu1  ;;  %v2119_v26 = vadd.f32 %v2118_v55, %v2117_v3  ;;  %v2120_v29 = vpop.f32.mrb[22].mxu0 }
 0x222   :  { %v2093_v22 = vpop.f32.mrb[19].mxu1  ;;  %v2121_v31 = vpop.f32.mrb[23].mxu0 }
 0x223   :  { %v1734_v24 = vadd.f32 %v2091_v51, %v1997_v37  ;;  %v2094_v25 = vadd.f32 %v2093_v22, %v2092_v21  ;;  %v2122_v30 = vadd.f32 %v2121_v31, %v2120_v29 }
 0x225   :  { %v1737_v60 = vadd.f32 %v2094_v25, %v1997_v37  ;;  %v1783_v32 = vadd.f32 %v2119_v26, %v1734_v24 }
 0x227   :  { %v1786_v33 = vadd.f32 %v2122_v30, %v1737_v60  ;;  %v2095_v35 = vpop.f32.mrb[20].mxu1 }
 0x228   :  { %v2096_v39 = vpop.f32.mrb[21].mxu1  ;;  %v2123_v46 = vpop.f32.mrb[24].mxu0 }
 0x229   :  { %v2097_v50 = vadd.f32 %v2096_v39, %v2095_v35  ;;  %v2098_v42 = vpop.f32.mrb[22].mxu1  ;;  %v2124_v54 = vpop.f32.mrb[25].mxu0 }
 0x22a   :  { %v2099_v47 = vpop.f32.mrb[23].mxu1  ;;  %v2125_v1 = vadd.f32 %v2124_v54, %v2123_v46  ;;  %v2126_v2 = vpop.f32.mrb[26].mxu0 }
 0x22b   :  { %v1742_v56 = vadd.f32 %v2097_v50, %v1997_v37  ;;  %v2100_v61 = vadd.f32 %v2099_v47, %v2098_v42  ;;  %v2127_v4 = vpop.f32.mrb[27].mxu0 }
 0x22c   :  { %v2128_v8 = vadd.f32 %v2127_v4, %v2126_v2 }
 0x22d   :  { %v1745_v57 = vadd.f32 %v2100_v61, %v1997_v37  ;;  %v1791_v6 = vadd.f32 %v2125_v1, %v1742_v56 }
 0x22f   :  { %v1794_v9 = vadd.f32 %v2128_v8, %v1745_v57 }
 0x23f   :  { %v2145_v10 = vpop.f32.mrb[24].mxu1 }
 0x240   :  { %v2146_v58 = vpop.f32.mrb[25].mxu1 }
 0x241   :  { %v2147_v36 = vadd.f32 %v2146_v58, %v2145_v10  ;;  %v2148_v48 = vpop.f32.mrb[26].mxu1  ;;  %v2173_v11 = vpop.f32.mrb[28].mxu0 }
 0x242   :  { %v2149_v12 = vpop.f32.mrb[27].mxu1  ;;  %v2174_v59 = vpop.f32.mrb[29].mxu0 }
 0x243   :  { %v1832_v38 = vadd.f32 %v2147_v36, %v1783_v32  ;;  %v2150_v13 = vadd.f32 %v2149_v12, %v2148_v48  ;;  %v2175_v14 = vadd.f32 %v2174_v59, %v2173_v11  ;;  %v2176_v40 = vpop.f32.mrb[30].mxu0 }
 0x244   :  { %v2177_v15 = vpop.f32.mrb[31].mxu0 }
 0x245   :  { %v1835_v16 = vadd.f32 %v2150_v13, %v1786_v33  ;;  %v1881_v18 = vadd.f32 %v2175_v14, %v1832_v38  ;;  %v2178_v62 = vadd.f32 %v2177_v15, %v2176_v40 }
 0x247   :  { %1895 = vst [vmem:[%s2845_s7] sm:$0xff] %v1881_v18  ;;  %v1884_v43 = vadd.f32 %v2178_v62, %v1835_v16  ;;  %v2151_v63 = vpop.f32.mrb[28].mxu1 }
 0x248   :  { %v2152_v53 = vpop.f32.mrb[29].mxu1 }
 0x249   :  { %1896 = vst [vmem:[%s2845_s7 + $0x8] sm:$0xff] %v1884_v43  ;;  %v2153_v41 = vadd.f32 %v2152_v53, %v2151_v63  ;;  %v2154_v20 = vpop.f32.mrb[30].mxu1 }
 0x24a   :  { %v2155_v44 = vpop.f32.mrb[31].mxu1 }
 0x24b   :  { %v1840_v5 = vadd.f32 %v2153_v41, %v1791_v6  ;;  %v2156_v17 = vadd.f32 %v2155_v44, %v2154_v20 }
 0x24d   :  { %v1843_v19 = vadd.f32 %v2156_v17, %v1794_v9 }
 0x25f   :  { %v2179_v49 = vpop.f32.mrb[32].mxu1 }
 0x260   :  { %v2180_v52 = vpop.f32.mrb[33].mxu1 }
 0x261   :  { %v2181_v23 = vadd.f32 %v2180_v52, %v2179_v49  ;;  %v2182_v0 = vpop.f32.mrb[34].mxu1 }
 0x262   :  { %v2183_v7 = vpop.f32.mrb[35].mxu1 }
 0x263   :  { %v1889_v27 = vadd.f32 %v2181_v23, %v1840_v5  ;;  %v2184_v28 = vadd.f32 %v2183_v7, %v2182_v0 }
 0x265   :  { %1897 = vst [vmem:[%s2845_s7 + $0x10] sm:$0xff] %v1889_v27  ;;  %v1892_v34 = vadd.f32 %v2184_v28, %v1843_v19 }
 0x267   :  { %1898 = vst [vmem:[%s2845_s7 + $0x18] sm:$0xff] %v1892_v34 }
 0x268   :  { %1922 = vsyncpa [#allocation4], 1 }
 0x269   :  { %1923 = vsyncpa [#allocation6], 1 }
 0x26a   :  { %1924 = vsyncpa [#allocation9], 1 }

</bundles_post_ra>
